<compile_context>
chip_gen: v5e
topology: v5e:2x2
jax: 0.10.0
libtpu: 0.0.40
codegen_flags: <defaults>
</compile_context>

<pallas_src>
import jax
import jax.numpy as jnp
from jax.experimental import pallas as pl
from jax.experimental.pallas import tpu as pltpu


NEG_SLOPE = 0.01  # PyTorch nn.LeakyReLU default


def _leaky(x):
    return jnp.where(x > 0, x, NEG_SLOPE * x)


def _cdiv(a, b):
    return -(-a // b)


def _round_up(x, m):
    return _cdiv(x, m) * m


def deepsets_kernel(feat_ref, mask_ref,
                    w1_ref, b1_ref, w2_ref, b2_ref,
                    w3_ref, b3_ref, w4_ref, b4_ref,
                    out_ref):
    # feat_ref: (TB, N*D) f32   mask_ref: (TB, N) f32   out_ref: (TB, C_pad) bf16
    tb = feat_ref.shape[0]
    n_set = mask_ref.shape[1]
    d_in = feat_ref.shape[1] // n_set

    x = feat_ref[...]                                   # (TB, N*D) f32
    mask = mask_ref[...]                                 # (TB, N)   f32
    w1 = w1_ref[...]                                     # (D, H)    f32
    b1 = b1_ref[...]                                     # (1, H)    f32

    # ---- phi layer 1 on the VPU: rank-1 broadcast-FMAs (K=3 is MXU-hostile).
    slabs = []
    for n in range(n_set):
        base = n * d_in
        acc = x[:, base:base + 1] * w1[0:1, :]
        for d in range(1, d_in):
            acc = acc + x[:, base + d:base + d + 1] * w1[d:d + 1, :]
        slabs.append(acc + b1)                           # (TB, H) f32
    # Stack particle slots along the sublane-major dim (cheap block concat).
    h = _leaky(jnp.concatenate(slabs, axis=0))           # (N*TB, H) f32

    # ---- phi layer 2 on the MXU (bf16 operands, f32 accumulation).
    h = jnp.dot(h.astype(jnp.bfloat16), w2_ref[...],
                preferred_element_type=jnp.float32) + b2_ref[...]
    h = _leaky(h)                                        # (N*TB, H) f32

    # ---- masked sum / mean pooling over the set dimension (VPU FMAs).
    h_sum = h[0:tb, :] * mask[:, 0:1]
    for n in range(1, n_set):
        h_sum = h_sum + h[n * tb:(n + 1) * tb, :] * mask[:, n:n + 1]
    denom = jnp.sum(mask, axis=1, keepdims=True)         # (TB, 1)
    # Only all-zero rows (batch padding / empty sets) are clamped; fractional
    # masks divide by their true sum, matching the PyTorch reference.
    inv = pl.reciprocal(jnp.where(denom > 0.0, denom, 1.0), approx=True)
    h_mean = h_sum * inv                                  # (TB, H)

    # ---- rho layer 1: single (TB,2H)@(2H,H) matmul; lane concat is cheap.
    pooled = jnp.concatenate([h_mean, h_sum], axis=1).astype(jnp.bfloat16)
    g = jnp.dot(pooled, w3_ref[...],
                preferred_element_type=jnp.float32) + b3_ref[...]
    g = _leaky(g)                                         # (TB, H)

    # ---- rho layer 2 (classifier head, output lanes zero-padded to 128).
    g = jnp.dot(g.astype(jnp.bfloat16), w4_ref[...],
                preferred_element_type=jnp.float32) + b4_ref[...]
    g = _leaky(g)                                         # (TB, C_pad)

    out_ref[...] = g.astype(out_ref.dtype)


def deepsets_forward(features, mask, params, *, tile_b=None):
    """features: (B, N, D) f32; mask: (B, N) f32; params: dict of f32 weights
    stored (in_dim, out_dim) so y = x @ W + b."""
    B, N, D = features.shape
    H = params["w1"].shape[1]
    C = params["w4"].shape[1]
    C_pad = 128 * _cdiv(C, 128)

    # --- batch tiling ------------------------------------------------------
    B8 = _round_up(max(B, 1), 8)
    if tile_b is None:
        # Prefer >=2 grid steps for realistic batches so both v7x TensorCores
        # get a tile; on single-TC v5e/v6e the extra step is ~0.35us.  Cap the
        # tile so TB*N stays a comfortable MXU M dimension.
        n_steps = max(2, _cdiv(B8, 256)) if B8 >= 16 else 1
    else:
        n_steps = _cdiv(B8, _round_up(min(tile_b, B8), 8))
    TB = _round_up(_cdiv(B8, n_steps), 8)
    n_steps = _cdiv(B8, TB)
    B_pad = n_steps * TB
    grid = (n_steps,)

    # --- operand prep ------------------------------------------------------
    # Flatten features to (B, N*D): minor dim 24 instead of 3 => ~8x less
    # lane-padded DMA per tile.  Kept f32 (phi layer 1 runs on the VPU).
    feats_flat = features.reshape(B, N * D).astype(jnp.float32)
    mask_f = mask.astype(jnp.float32)
    if B_pad != B:
        feats_flat = jnp.pad(feats_flat, ((0, B_pad - B), (0, 0)))
        mask_f = jnp.pad(mask_f, ((0, B_pad - B), (0, 0)))

    w1 = params["w1"].astype(jnp.float32)                 # (D, H), stays f32
    w2 = params["w2"].astype(jnp.bfloat16)                # (H, H)
    w3 = params["w3"].astype(jnp.bfloat16)                # (2H, H), merged rho-1
    w4 = jnp.pad(params["w4"], ((0, 0), (0, C_pad - C))).astype(jnp.bfloat16)
    b1 = params["b1"].astype(jnp.float32)
    b2 = params["b2"].astype(jnp.float32)
    b3 = params["b3"].astype(jnp.float32)
    b4 = jnp.pad(params["b4"], ((0, 0), (0, C_pad - C))).astype(jnp.float32)

    def full(a):
        zeros = (0,) * a.ndim
        return pl.BlockSpec(a.shape, lambda b, z=zeros: z)

    # --- cost estimate (counts real lane-padded tile traffic) ---------------
    def lane(v):
        return 128 * _cdiv(v, 128)

    flops = (2 * B_pad * N * (D * H + H * H)
             + 2 * B_pad * (2 * H * H + H * C_pad))
    bytes_accessed = (B_pad * lane(N * D) * 4       # feature tiles (lane-padded)
                      + B_pad * lane(N) * 4         # mask tiles (lane-padded)
                      + B_pad * C_pad * 2           # bf16 output writeback
                      + 4 * D * H                   # w1 (f32)
                      + 2 * (H * H + 2 * H * H + H * C_pad)   # bf16 weights
                      + 4 * (3 * H + C_pad))        # f32 biases
    cost = pl.CostEstimate(flops=flops, transcendentals=B_pad,
                           bytes_accessed=bytes_accessed)

    out = pl.pallas_call(
        deepsets_kernel,
        out_shape=jax.ShapeDtypeStruct((B_pad, C_pad), jnp.bfloat16),
        grid=grid,
        in_specs=[
            pl.BlockSpec((TB, N * D), lambda b: (b, 0)),   # flattened features
            pl.BlockSpec((TB, N), lambda b: (b, 0)),       # mask
            # Weight/bias index_maps are grid-invariant -> fetched once.
            full(w1), full(b1), full(w2), full(b2),
            full(w3), full(b3), full(w4), full(b4),
        ],
        out_specs=pl.BlockSpec((TB, C_pad), lambda b: (b, 0)),
        compiler_params=pltpu.CompilerParams(
            dimension_semantics=("parallel",)),
        cost_estimate=cost,
    )(feats_flat, mask_f, w1, b1, w2, b2, w3, b3, w4, b4)

    return out.astype(jnp.float32)[:B, :C]


def deepsets_reference(features, mask, params):
    """Pure-JAX f32 reference matching the PyTorch forward."""
    m = mask[..., None]                                        # (B, N, 1)
    h = _leaky(jnp.einsum("bnd,dh->bnh", features, params["w1"]) + params["b1"])
    h = _leaky(jnp.einsum("bnh,hk->bnk", h, params["w2"]) + params["b2"])
    h_sum = jnp.sum(h * m, axis=1)                             # (B, H)
    h_mean = h_sum / jnp.sum(m, axis=1)                        # (B, H)
    pooled = jnp.concatenate([h_mean, h_sum], axis=1)          # (B, 2H)
    g = _leaky(pooled @ params["w3"] + params["b3"])
    g = _leaky(g @ params["w4"] + params["b4"])
    return g


def init_params(key, dim, dim_hidden, num_classes):
    ks = jax.random.split(key, 8)
    scale = 0.1
    return {
        "w1": scale * jax.random.normal(ks[0], (dim, dim_hidden), jnp.float32),
        "b1": scale * jax.random.normal(ks[1], (1, dim_hidden), jnp.float32),
        "w2": scale * jax.random.normal(ks[2], (dim_hidden, dim_hidden), jnp.float32),
        "b2": scale * jax.random.normal(ks[3], (1, dim_hidden), jnp.float32),
        "w3": scale * jax.random.normal(ks[4], (2 * dim_hidden, dim_hidden), jnp.float32),
        "b3": scale * jax.random.normal(ks[5], (1, dim_hidden), jnp.float32),
        "w4": scale * jax.random.normal(ks[6], (dim_hidden, num_classes), jnp.float32),
        "b4": scale * jax.random.normal(ks[7], (1, num_classes), jnp.float32),
    }


if __name__ == "__main__":
    # Module-consistent small shapes: dim_input=3, dim_hidden=128, dim_output=2,
    # num_layers_1=2, num_layers_2=2, set size (particles) = 8, batch = 8.
    B, N, D, H, C = 8, 8, 3, 128, 2

    key = jax.random.PRNGKey(0)
    k_feat, k_mask, k_par, k_feat2, k_mask2 = jax.random.split(key, 5)

    features = jax.random.normal(k_feat, (B, N, D), jnp.float32)
    mask = (jax.random.uniform(k_mask, (B, N)) > 0.3).astype(jnp.float32)
    mask = mask.at[:, 0].set(1.0)  # ensure at least one valid particle per set

    params = init_params(k_par, D, H, C)

    out = jax.block_until_ready(deepsets_forward(features, mask, params))
    ref = deepsets_reference(features, mask, params)
    assert out.shape == (B, C)
    # bf16 MXU operands + approx reciprocal + bf16 output -> small drift vs f32.
    assert jnp.allclose(out, ref, atol=2e-2, rtol=2e-2), (
        float(jnp.max(jnp.abs(out - ref))))

    # Padded-batch / multi-step grid path with a SOFT (fractional) mask whose
    # per-set sum is < 1, exercising the corrected denominator guard.
    B2 = 19
    feats2 = jax.random.normal(k_feat2, (B2, N, D), jnp.float32)
    mask2 = 0.25 * jax.random.uniform(k_mask2, (B2, N), jnp.float32)
    out2 = jax.block_until_ready(deepsets_forward(feats2, mask2, params, tile_b=8))
    ref2 = deepsets_reference(feats2, mask2, params)
    assert out2.shape == (B2, C)
    assert jnp.allclose(out2, ref2, atol=2e-2, rtol=2e-2), (
        float(jnp.max(jnp.abs(out2 - ref2))))

    print("KERNEL_OK")
</pallas_src>

<mosaic_0001>
module attributes {stable_mosaic.version = 11 : i64} {
  func.func @deepsets_kernel(%arg0: i32, %arg1: memref<8x24xf32, #tpu.memory_space<vmem>>, %arg2: memref<8x8xf32, #tpu.memory_space<vmem>>, %arg3: memref<3x128xf32, #tpu.memory_space<vmem>>, %arg4: memref<1x128xf32, #tpu.memory_space<vmem>>, %arg5: memref<128x128xbf16, #tpu.memory_space<vmem>>, %arg6: memref<1x128xf32, #tpu.memory_space<vmem>>, %arg7: memref<256x128xbf16, #tpu.memory_space<vmem>>, %arg8: memref<1x128xf32, #tpu.memory_space<vmem>>, %arg9: memref<128x128xbf16, #tpu.memory_space<vmem>>, %arg10: memref<1x128xf32, #tpu.memory_space<vmem>>, %arg11: memref<8x128xbf16, #tpu.memory_space<vmem>>) attributes {dimension_semantics = [#tpu.dimension_semantics<parallel>], iteration_bounds = array<i64: 1>, scalar_prefetch = 0 : i64, scratch_operands = 0 : i64, tpu.core_type = #tpu.core_type<tc>, window_params = [{transform_indices = @transform_0, window_bounds = array<i64: 8, 24>}, {transform_indices = @transform_1, window_bounds = array<i64: 8, 8>}, {pipeline_mode = #tpu.pipeline_mode<synchronous>, transform_indices = @transform_2, window_bounds = array<i64: 3, 128>}, {pipeline_mode = #tpu.pipeline_mode<synchronous>, transform_indices = @transform_3, window_bounds = array<i64: 1, 128>}, {pipeline_mode = #tpu.pipeline_mode<synchronous>, transform_indices = @transform_4, window_bounds = array<i64: 128, 128>}, {pipeline_mode = #tpu.pipeline_mode<synchronous>, transform_indices = @transform_5, window_bounds = array<i64: 1, 128>}, {pipeline_mode = #tpu.pipeline_mode<synchronous>, transform_indices = @transform_6, window_bounds = array<i64: 256, 128>}, {pipeline_mode = #tpu.pipeline_mode<synchronous>, transform_indices = @transform_7, window_bounds = array<i64: 1, 128>}, {pipeline_mode = #tpu.pipeline_mode<synchronous>, transform_indices = @transform_8, window_bounds = array<i64: 128, 128>}, {pipeline_mode = #tpu.pipeline_mode<synchronous>, transform_indices = @transform_9, window_bounds = array<i64: 1, 128>}, {transform_indices = @transform_10, window_bounds = array<i64: 8, 128>}]} {
    %c0 = arith.constant 0 : index
    %c0_0 = arith.constant 0 : index
    %0 = vector.load %arg1[%c0, %c0_0] : memref<8x24xf32, #tpu.memory_space<vmem>>, vector<8x24xf32>
    %c0_1 = arith.constant 0 : index
    %c0_2 = arith.constant 0 : index
    %1 = vector.load %arg2[%c0_1, %c0_2] : memref<8x8xf32, #tpu.memory_space<vmem>>, vector<8x8xf32>
    %c0_3 = arith.constant 0 : index
    %c0_4 = arith.constant 0 : index
    %2 = vector.load %arg3[%c0_3, %c0_4] : memref<3x128xf32, #tpu.memory_space<vmem>>, vector<3x128xf32>
    %c0_5 = arith.constant 0 : index
    %c0_6 = arith.constant 0 : index
    %3 = vector.load %arg4[%c0_5, %c0_6] : memref<1x128xf32, #tpu.memory_space<vmem>>, vector<1x128xf32>
    %4 = vector.extract_strided_slice %0 {offsets = [0, 0], sizes = [8, 1], strides = [1, 1]} : vector<8x24xf32> to vector<8x1xf32>
    %5 = vector.extract_strided_slice %2 {offsets = [0, 0], sizes = [1, 128], strides = [1, 1]} : vector<3x128xf32> to vector<1x128xf32>
    %6 = vector.broadcast %4 : vector<8x1xf32> to vector<8x128xf32>
    %7 = vector.broadcast %5 : vector<1x128xf32> to vector<8x128xf32>
    %8 = arith.mulf %6, %7 : vector<8x128xf32>
    %9 = vector.extract_strided_slice %0 {offsets = [0, 1], sizes = [8, 1], strides = [1, 1]} : vector<8x24xf32> to vector<8x1xf32>
    %10 = vector.extract_strided_slice %2 {offsets = [1, 0], sizes = [1, 128], strides = [1, 1]} : vector<3x128xf32> to vector<1x128xf32>
    %11 = vector.broadcast %9 : vector<8x1xf32> to vector<8x128xf32>
    %12 = vector.broadcast %10 : vector<1x128xf32> to vector<8x128xf32>
    %13 = arith.mulf %11, %12 : vector<8x128xf32>
    %14 = arith.addf %8, %13 : vector<8x128xf32>
    %15 = vector.extract_strided_slice %0 {offsets = [0, 2], sizes = [8, 1], strides = [1, 1]} : vector<8x24xf32> to vector<8x1xf32>
    %16 = vector.extract_strided_slice %2 {offsets = [2, 0], sizes = [1, 128], strides = [1, 1]} : vector<3x128xf32> to vector<1x128xf32>
    %17 = vector.broadcast %15 : vector<8x1xf32> to vector<8x128xf32>
    %18 = vector.broadcast %16 : vector<1x128xf32> to vector<8x128xf32>
    %19 = arith.mulf %17, %18 : vector<8x128xf32>
    %20 = arith.addf %14, %19 : vector<8x128xf32>
    %21 = vector.broadcast %3 : vector<1x128xf32> to vector<8x128xf32>
    %22 = arith.addf %20, %21 : vector<8x128xf32>
    %23 = vector.extract_strided_slice %0 {offsets = [0, 3], sizes = [8, 1], strides = [1, 1]} : vector<8x24xf32> to vector<8x1xf32>
    %24 = vector.extract_strided_slice %2 {offsets = [0, 0], sizes = [1, 128], strides = [1, 1]} : vector<3x128xf32> to vector<1x128xf32>
    %25 = vector.broadcast %23 : vector<8x1xf32> to vector<8x128xf32>
    %26 = vector.broadcast %24 : vector<1x128xf32> to vector<8x128xf32>
    %27 = arith.mulf %25, %26 : vector<8x128xf32>
    %28 = vector.extract_strided_slice %0 {offsets = [0, 4], sizes = [8, 1], strides = [1, 1]} : vector<8x24xf32> to vector<8x1xf32>
    %29 = vector.extract_strided_slice %2 {offsets = [1, 0], sizes = [1, 128], strides = [1, 1]} : vector<3x128xf32> to vector<1x128xf32>
    %30 = vector.broadcast %28 : vector<8x1xf32> to vector<8x128xf32>
    %31 = vector.broadcast %29 : vector<1x128xf32> to vector<8x128xf32>
    %32 = arith.mulf %30, %31 : vector<8x128xf32>
    %33 = arith.addf %27, %32 : vector<8x128xf32>
    %34 = vector.extract_strided_slice %0 {offsets = [0, 5], sizes = [8, 1], strides = [1, 1]} : vector<8x24xf32> to vector<8x1xf32>
    %35 = vector.extract_strided_slice %2 {offsets = [2, 0], sizes = [1, 128], strides = [1, 1]} : vector<3x128xf32> to vector<1x128xf32>
    %36 = vector.broadcast %34 : vector<8x1xf32> to vector<8x128xf32>
    %37 = vector.broadcast %35 : vector<1x128xf32> to vector<8x128xf32>
    %38 = arith.mulf %36, %37 : vector<8x128xf32>
    %39 = arith.addf %33, %38 : vector<8x128xf32>
    %40 = vector.broadcast %3 : vector<1x128xf32> to vector<8x128xf32>
    %41 = arith.addf %39, %40 : vector<8x128xf32>
    %42 = vector.extract_strided_slice %0 {offsets = [0, 6], sizes = [8, 1], strides = [1, 1]} : vector<8x24xf32> to vector<8x1xf32>
    %43 = vector.extract_strided_slice %2 {offsets = [0, 0], sizes = [1, 128], strides = [1, 1]} : vector<3x128xf32> to vector<1x128xf32>
    %44 = vector.broadcast %42 : vector<8x1xf32> to vector<8x128xf32>
    %45 = vector.broadcast %43 : vector<1x128xf32> to vector<8x128xf32>
    %46 = arith.mulf %44, %45 : vector<8x128xf32>
    %47 = vector.extract_strided_slice %0 {offsets = [0, 7], sizes = [8, 1], strides = [1, 1]} : vector<8x24xf32> to vector<8x1xf32>
    %48 = vector.extract_strided_slice %2 {offsets = [1, 0], sizes = [1, 128], strides = [1, 1]} : vector<3x128xf32> to vector<1x128xf32>
    %49 = vector.broadcast %47 : vector<8x1xf32> to vector<8x128xf32>
    %50 = vector.broadcast %48 : vector<1x128xf32> to vector<8x128xf32>
    %51 = arith.mulf %49, %50 : vector<8x128xf32>
    %52 = arith.addf %46, %51 : vector<8x128xf32>
    %53 = vector.extract_strided_slice %0 {offsets = [0, 8], sizes = [8, 1], strides = [1, 1]} : vector<8x24xf32> to vector<8x1xf32>
    %54 = vector.extract_strided_slice %2 {offsets = [2, 0], sizes = [1, 128], strides = [1, 1]} : vector<3x128xf32> to vector<1x128xf32>
    %55 = vector.broadcast %53 : vector<8x1xf32> to vector<8x128xf32>
    %56 = vector.broadcast %54 : vector<1x128xf32> to vector<8x128xf32>
    %57 = arith.mulf %55, %56 : vector<8x128xf32>
    %58 = arith.addf %52, %57 : vector<8x128xf32>
    %59 = vector.broadcast %3 : vector<1x128xf32> to vector<8x128xf32>
    %60 = arith.addf %58, %59 : vector<8x128xf32>
    %61 = vector.extract_strided_slice %0 {offsets = [0, 9], sizes = [8, 1], strides = [1, 1]} : vector<8x24xf32> to vector<8x1xf32>
    %62 = vector.extract_strided_slice %2 {offsets = [0, 0], sizes = [1, 128], strides = [1, 1]} : vector<3x128xf32> to vector<1x128xf32>
    %63 = vector.broadcast %61 : vector<8x1xf32> to vector<8x128xf32>
    %64 = vector.broadcast %62 : vector<1x128xf32> to vector<8x128xf32>
    %65 = arith.mulf %63, %64 : vector<8x128xf32>
    %66 = vector.extract_strided_slice %0 {offsets = [0, 10], sizes = [8, 1], strides = [1, 1]} : vector<8x24xf32> to vector<8x1xf32>
    %67 = vector.extract_strided_slice %2 {offsets = [1, 0], sizes = [1, 128], strides = [1, 1]} : vector<3x128xf32> to vector<1x128xf32>
    %68 = vector.broadcast %66 : vector<8x1xf32> to vector<8x128xf32>
    %69 = vector.broadcast %67 : vector<1x128xf32> to vector<8x128xf32>
    %70 = arith.mulf %68, %69 : vector<8x128xf32>
    %71 = arith.addf %65, %70 : vector<8x128xf32>
    %72 = vector.extract_strided_slice %0 {offsets = [0, 11], sizes = [8, 1], strides = [1, 1]} : vector<8x24xf32> to vector<8x1xf32>
    %73 = vector.extract_strided_slice %2 {offsets = [2, 0], sizes = [1, 128], strides = [1, 1]} : vector<3x128xf32> to vector<1x128xf32>
    %74 = vector.broadcast %72 : vector<8x1xf32> to vector<8x128xf32>
    %75 = vector.broadcast %73 : vector<1x128xf32> to vector<8x128xf32>
    %76 = arith.mulf %74, %75 : vector<8x128xf32>
    %77 = arith.addf %71, %76 : vector<8x128xf32>
    %78 = vector.broadcast %3 : vector<1x128xf32> to vector<8x128xf32>
    %79 = arith.addf %77, %78 : vector<8x128xf32>
    %80 = vector.extract_strided_slice %0 {offsets = [0, 12], sizes = [8, 1], strides = [1, 1]} : vector<8x24xf32> to vector<8x1xf32>
    %81 = vector.extract_strided_slice %2 {offsets = [0, 0], sizes = [1, 128], strides = [1, 1]} : vector<3x128xf32> to vector<1x128xf32>
    %82 = vector.broadcast %80 : vector<8x1xf32> to vector<8x128xf32>
    %83 = vector.broadcast %81 : vector<1x128xf32> to vector<8x128xf32>
    %84 = arith.mulf %82, %83 : vector<8x128xf32>
    %85 = vector.extract_strided_slice %0 {offsets = [0, 13], sizes = [8, 1], strides = [1, 1]} : vector<8x24xf32> to vector<8x1xf32>
    %86 = vector.extract_strided_slice %2 {offsets = [1, 0], sizes = [1, 128], strides = [1, 1]} : vector<3x128xf32> to vector<1x128xf32>
    %87 = vector.broadcast %85 : vector<8x1xf32> to vector<8x128xf32>
    %88 = vector.broadcast %86 : vector<1x128xf32> to vector<8x128xf32>
    %89 = arith.mulf %87, %88 : vector<8x128xf32>
    %90 = arith.addf %84, %89 : vector<8x128xf32>
    %91 = vector.extract_strided_slice %0 {offsets = [0, 14], sizes = [8, 1], strides = [1, 1]} : vector<8x24xf32> to vector<8x1xf32>
    %92 = vector.extract_strided_slice %2 {offsets = [2, 0], sizes = [1, 128], strides = [1, 1]} : vector<3x128xf32> to vector<1x128xf32>
    %93 = vector.broadcast %91 : vector<8x1xf32> to vector<8x128xf32>
    %94 = vector.broadcast %92 : vector<1x128xf32> to vector<8x128xf32>
    %95 = arith.mulf %93, %94 : vector<8x128xf32>
    %96 = arith.addf %90, %95 : vector<8x128xf32>
    %97 = vector.broadcast %3 : vector<1x128xf32> to vector<8x128xf32>
    %98 = arith.addf %96, %97 : vector<8x128xf32>
    %99 = vector.extract_strided_slice %0 {offsets = [0, 15], sizes = [8, 1], strides = [1, 1]} : vector<8x24xf32> to vector<8x1xf32>
    %100 = vector.extract_strided_slice %2 {offsets = [0, 0], sizes = [1, 128], strides = [1, 1]} : vector<3x128xf32> to vector<1x128xf32>
    %101 = vector.broadcast %99 : vector<8x1xf32> to vector<8x128xf32>
    %102 = vector.broadcast %100 : vector<1x128xf32> to vector<8x128xf32>
    %103 = arith.mulf %101, %102 : vector<8x128xf32>
    %104 = vector.extract_strided_slice %0 {offsets = [0, 16], sizes = [8, 1], strides = [1, 1]} : vector<8x24xf32> to vector<8x1xf32>
    %105 = vector.extract_strided_slice %2 {offsets = [1, 0], sizes = [1, 128], strides = [1, 1]} : vector<3x128xf32> to vector<1x128xf32>
    %106 = vector.broadcast %104 : vector<8x1xf32> to vector<8x128xf32>
    %107 = vector.broadcast %105 : vector<1x128xf32> to vector<8x128xf32>
    %108 = arith.mulf %106, %107 : vector<8x128xf32>
    %109 = arith.addf %103, %108 : vector<8x128xf32>
    %110 = vector.extract_strided_slice %0 {offsets = [0, 17], sizes = [8, 1], strides = [1, 1]} : vector<8x24xf32> to vector<8x1xf32>
    %111 = vector.extract_strided_slice %2 {offsets = [2, 0], sizes = [1, 128], strides = [1, 1]} : vector<3x128xf32> to vector<1x128xf32>
    %112 = vector.broadcast %110 : vector<8x1xf32> to vector<8x128xf32>
    %113 = vector.broadcast %111 : vector<1x128xf32> to vector<8x128xf32>
    %114 = arith.mulf %112, %113 : vector<8x128xf32>
    %115 = arith.addf %109, %114 : vector<8x128xf32>
    %116 = vector.broadcast %3 : vector<1x128xf32> to vector<8x128xf32>
    %117 = arith.addf %115, %116 : vector<8x128xf32>
    %118 = vector.extract_strided_slice %0 {offsets = [0, 18], sizes = [8, 1], strides = [1, 1]} : vector<8x24xf32> to vector<8x1xf32>
    %119 = vector.extract_strided_slice %2 {offsets = [0, 0], sizes = [1, 128], strides = [1, 1]} : vector<3x128xf32> to vector<1x128xf32>
    %120 = vector.broadcast %118 : vector<8x1xf32> to vector<8x128xf32>
    %121 = vector.broadcast %119 : vector<1x128xf32> to vector<8x128xf32>
    %122 = arith.mulf %120, %121 : vector<8x128xf32>
    %123 = vector.extract_strided_slice %0 {offsets = [0, 19], sizes = [8, 1], strides = [1, 1]} : vector<8x24xf32> to vector<8x1xf32>
    %124 = vector.extract_strided_slice %2 {offsets = [1, 0], sizes = [1, 128], strides = [1, 1]} : vector<3x128xf32> to vector<1x128xf32>
    %125 = vector.broadcast %123 : vector<8x1xf32> to vector<8x128xf32>
    %126 = vector.broadcast %124 : vector<1x128xf32> to vector<8x128xf32>
    %127 = arith.mulf %125, %126 : vector<8x128xf32>
    %128 = arith.addf %122, %127 : vector<8x128xf32>
    %129 = vector.extract_strided_slice %0 {offsets = [0, 20], sizes = [8, 1], strides = [1, 1]} : vector<8x24xf32> to vector<8x1xf32>
    %130 = vector.extract_strided_slice %2 {offsets = [2, 0], sizes = [1, 128], strides = [1, 1]} : vector<3x128xf32> to vector<1x128xf32>
    %131 = vector.broadcast %129 : vector<8x1xf32> to vector<8x128xf32>
    %132 = vector.broadcast %130 : vector<1x128xf32> to vector<8x128xf32>
    %133 = arith.mulf %131, %132 : vector<8x128xf32>
    %134 = arith.addf %128, %133 : vector<8x128xf32>
    %135 = vector.broadcast %3 : vector<1x128xf32> to vector<8x128xf32>
    %136 = arith.addf %134, %135 : vector<8x128xf32>
    %137 = vector.extract_strided_slice %0 {offsets = [0, 21], sizes = [8, 1], strides = [1, 1]} : vector<8x24xf32> to vector<8x1xf32>
    %138 = vector.extract_strided_slice %2 {offsets = [0, 0], sizes = [1, 128], strides = [1, 1]} : vector<3x128xf32> to vector<1x128xf32>
    %139 = vector.broadcast %137 : vector<8x1xf32> to vector<8x128xf32>
    %140 = vector.broadcast %138 : vector<1x128xf32> to vector<8x128xf32>
    %141 = arith.mulf %139, %140 : vector<8x128xf32>
    %142 = vector.extract_strided_slice %0 {offsets = [0, 22], sizes = [8, 1], strides = [1, 1]} : vector<8x24xf32> to vector<8x1xf32>
    %143 = vector.extract_strided_slice %2 {offsets = [1, 0], sizes = [1, 128], strides = [1, 1]} : vector<3x128xf32> to vector<1x128xf32>
    %144 = vector.broadcast %142 : vector<8x1xf32> to vector<8x128xf32>
    %145 = vector.broadcast %143 : vector<1x128xf32> to vector<8x128xf32>
    %146 = arith.mulf %144, %145 : vector<8x128xf32>
    %147 = arith.addf %141, %146 : vector<8x128xf32>
    %148 = vector.extract_strided_slice %0 {offsets = [0, 23], sizes = [8, 1], strides = [1, 1]} : vector<8x24xf32> to vector<8x1xf32>
    %149 = vector.extract_strided_slice %2 {offsets = [2, 0], sizes = [1, 128], strides = [1, 1]} : vector<3x128xf32> to vector<1x128xf32>
    %150 = vector.broadcast %148 : vector<8x1xf32> to vector<8x128xf32>
    %151 = vector.broadcast %149 : vector<1x128xf32> to vector<8x128xf32>
    %152 = arith.mulf %150, %151 : vector<8x128xf32>
    %153 = arith.addf %147, %152 : vector<8x128xf32>
    %154 = vector.broadcast %3 : vector<1x128xf32> to vector<8x128xf32>
    %155 = arith.addf %153, %154 : vector<8x128xf32>
    %156 = tpu.concatenate %22, %41, %60, %79, %98, %117, %136, %155 in 0 : vector<8x128xf32>, vector<8x128xf32>, vector<8x128xf32>, vector<8x128xf32>, vector<8x128xf32>, vector<8x128xf32>, vector<8x128xf32>, vector<8x128xf32> -> vector<64x128xf32>
    %cst = arith.constant 0.000000e+00 : f32
    %157 = vector.broadcast %cst : f32 to vector<64x128xf32>
    %158 = arith.cmpf ogt, %156, %157 : vector<64x128xf32>
    %cst_7 = arith.constant 0.00999999977 : f32
    %159 = vector.broadcast %cst_7 : f32 to vector<64x128xf32>
    %160 = arith.mulf %159, %156 : vector<64x128xf32>
    %161 = arith.select %158, %156, %160 : vector<64x128xi1>, vector<64x128xf32>
    %162 = arith.truncf %161 : vector<64x128xf32> to vector<64x128xbf16>
    %c0_8 = arith.constant 0 : index
    %c0_9 = arith.constant 0 : index
    %163 = vector.load %arg5[%c0_8, %c0_9] : memref<128x128xbf16, #tpu.memory_space<vmem>>, vector<128x128xbf16>
    %cst_10 = arith.constant dense<0.000000e+00> : vector<64x128xf32>
    %164 = tpu.matmul %162, %163, %cst_10 {dimension_numbers = #tpu.dot_dimension_numbers<[1], [0], [0], [1], [0, 0, 1, 1], [], []>} : vector<64x128xbf16>, vector<128x128xbf16>, vector<64x128xf32> -> vector<64x128xf32>
    %c0_11 = arith.constant 0 : index
    %c0_12 = arith.constant 0 : index
    %165 = vector.load %arg6[%c0_11, %c0_12] : memref<1x128xf32, #tpu.memory_space<vmem>>, vector<1x128xf32>
    %166 = vector.broadcast %165 : vector<1x128xf32> to vector<64x128xf32>
    %167 = arith.addf %164, %166 : vector<64x128xf32>
    %cst_13 = arith.constant 0.000000e+00 : f32
    %168 = vector.broadcast %cst_13 : f32 to vector<64x128xf32>
    %169 = arith.cmpf ogt, %167, %168 : vector<64x128xf32>
    %cst_14 = arith.constant 0.00999999977 : f32
    %170 = vector.broadcast %cst_14 : f32 to vector<64x128xf32>
    %171 = arith.mulf %170, %167 : vector<64x128xf32>
    %172 = arith.select %169, %167, %171 : vector<64x128xi1>, vector<64x128xf32>
    %173 = vector.extract_strided_slice %172 {offsets = [0, 0], sizes = [8, 128], strides = [1, 1]} : vector<64x128xf32> to vector<8x128xf32>
    %174 = vector.extract_strided_slice %1 {offsets = [0, 0], sizes = [8, 1], strides = [1, 1]} : vector<8x8xf32> to vector<8x1xf32>
    %175 = vector.broadcast %174 : vector<8x1xf32> to vector<8x128xf32>
    %176 = arith.mulf %173, %175 : vector<8x128xf32>
    %177 = vector.extract_strided_slice %172 {offsets = [8, 0], sizes = [8, 128], strides = [1, 1]} : vector<64x128xf32> to vector<8x128xf32>
    %178 = vector.extract_strided_slice %1 {offsets = [0, 1], sizes = [8, 1], strides = [1, 1]} : vector<8x8xf32> to vector<8x1xf32>
    %179 = vector.broadcast %178 : vector<8x1xf32> to vector<8x128xf32>
    %180 = arith.mulf %177, %179 : vector<8x128xf32>
    %181 = arith.addf %176, %180 : vector<8x128xf32>
    %182 = vector.extract_strided_slice %172 {offsets = [16, 0], sizes = [8, 128], strides = [1, 1]} : vector<64x128xf32> to vector<8x128xf32>
    %183 = vector.extract_strided_slice %1 {offsets = [0, 2], sizes = [8, 1], strides = [1, 1]} : vector<8x8xf32> to vector<8x1xf32>
    %184 = vector.broadcast %183 : vector<8x1xf32> to vector<8x128xf32>
    %185 = arith.mulf %182, %184 : vector<8x128xf32>
    %186 = arith.addf %181, %185 : vector<8x128xf32>
    %187 = vector.extract_strided_slice %172 {offsets = [24, 0], sizes = [8, 128], strides = [1, 1]} : vector<64x128xf32> to vector<8x128xf32>
    %188 = vector.extract_strided_slice %1 {offsets = [0, 3], sizes = [8, 1], strides = [1, 1]} : vector<8x8xf32> to vector<8x1xf32>
    %189 = vector.broadcast %188 : vector<8x1xf32> to vector<8x128xf32>
    %190 = arith.mulf %187, %189 : vector<8x128xf32>
    %191 = arith.addf %186, %190 : vector<8x128xf32>
    %192 = vector.extract_strided_slice %172 {offsets = [32, 0], sizes = [8, 128], strides = [1, 1]} : vector<64x128xf32> to vector<8x128xf32>
    %193 = vector.extract_strided_slice %1 {offsets = [0, 4], sizes = [8, 1], strides = [1, 1]} : vector<8x8xf32> to vector<8x1xf32>
    %194 = vector.broadcast %193 : vector<8x1xf32> to vector<8x128xf32>
    %195 = arith.mulf %192, %194 : vector<8x128xf32>
    %196 = arith.addf %191, %195 : vector<8x128xf32>
    %197 = vector.extract_strided_slice %172 {offsets = [40, 0], sizes = [8, 128], strides = [1, 1]} : vector<64x128xf32> to vector<8x128xf32>
    %198 = vector.extract_strided_slice %1 {offsets = [0, 5], sizes = [8, 1], strides = [1, 1]} : vector<8x8xf32> to vector<8x1xf32>
    %199 = vector.broadcast %198 : vector<8x1xf32> to vector<8x128xf32>
    %200 = arith.mulf %197, %199 : vector<8x128xf32>
    %201 = arith.addf %196, %200 : vector<8x128xf32>
    %202 = vector.extract_strided_slice %172 {offsets = [48, 0], sizes = [8, 128], strides = [1, 1]} : vector<64x128xf32> to vector<8x128xf32>
    %203 = vector.extract_strided_slice %1 {offsets = [0, 6], sizes = [8, 1], strides = [1, 1]} : vector<8x8xf32> to vector<8x1xf32>
    %204 = vector.broadcast %203 : vector<8x1xf32> to vector<8x128xf32>
    %205 = arith.mulf %202, %204 : vector<8x128xf32>
    %206 = arith.addf %201, %205 : vector<8x128xf32>
    %207 = vector.extract_strided_slice %172 {offsets = [56, 0], sizes = [8, 128], strides = [1, 1]} : vector<64x128xf32> to vector<8x128xf32>
    %208 = vector.extract_strided_slice %1 {offsets = [0, 7], sizes = [8, 1], strides = [1, 1]} : vector<8x8xf32> to vector<8x1xf32>
    %209 = vector.broadcast %208 : vector<8x1xf32> to vector<8x128xf32>
    %210 = arith.mulf %207, %209 : vector<8x128xf32>
    %211 = arith.addf %206, %210 : vector<8x128xf32>
    %cst_15 = arith.constant dense<0.000000e+00> : vector<8xf32>
    %212 = vector.multi_reduction <add>, %1, %cst_15 [1] : vector<8x8xf32> to vector<8xf32>
    %213 = vector.shape_cast %212 : vector<8xf32> to vector<8x1xf32>
    %cst_16 = arith.constant 0.000000e+00 : f32
    %214 = vector.broadcast %cst_16 : f32 to vector<8x1xf32>
    %215 = arith.cmpf ogt, %213, %214 : vector<8x1xf32>
    %cst_17 = arith.constant 1.000000e+00 : f32
    %216 = vector.broadcast %cst_17 : f32 to vector<8x1xf32>
    %217 = arith.select %215, %213, %216 : vector<8x1xi1>, vector<8x1xf32>
    %218 = tpu.reciprocal %217 {approx = true} : vector<8x1xf32> -> vector<8x1xf32>
    %219 = vector.broadcast %218 : vector<8x1xf32> to vector<8x128xf32>
    %220 = arith.mulf %211, %219 : vector<8x128xf32>
    %221 = tpu.concatenate %220, %211 in 1 : vector<8x128xf32>, vector<8x128xf32> -> vector<8x256xf32>
    %222 = arith.truncf %221 : vector<8x256xf32> to vector<8x256xbf16>
    %c0_18 = arith.constant 0 : index
    %c0_19 = arith.constant 0 : index
    %223 = vector.load %arg7[%c0_18, %c0_19] : memref<256x128xbf16, #tpu.memory_space<vmem>>, vector<256x128xbf16>
    %cst_20 = arith.constant dense<0.000000e+00> : vector<8x128xf32>
    %224 = tpu.matmul %222, %223, %cst_20 {dimension_numbers = #tpu.dot_dimension_numbers<[1], [0], [0], [1], [0, 0, 1, 1], [], []>} : vector<8x256xbf16>, vector<256x128xbf16>, vector<8x128xf32> -> vector<8x128xf32>
    %c0_21 = arith.constant 0 : index
    %c0_22 = arith.constant 0 : index
    %225 = vector.load %arg8[%c0_21, %c0_22] : memref<1x128xf32, #tpu.memory_space<vmem>>, vector<1x128xf32>
    %226 = vector.broadcast %225 : vector<1x128xf32> to vector<8x128xf32>
    %227 = arith.addf %224, %226 : vector<8x128xf32>
    %cst_23 = arith.constant 0.000000e+00 : f32
    %228 = vector.broadcast %cst_23 : f32 to vector<8x128xf32>
    %229 = arith.cmpf ogt, %227, %228 : vector<8x128xf32>
    %cst_24 = arith.constant 0.00999999977 : f32
    %230 = vector.broadcast %cst_24 : f32 to vector<8x128xf32>
    %231 = arith.mulf %230, %227 : vector<8x128xf32>
    %232 = arith.select %229, %227, %231 : vector<8x128xi1>, vector<8x128xf32>
    %233 = arith.truncf %232 : vector<8x128xf32> to vector<8x128xbf16>
    %c0_25 = arith.constant 0 : index
    %c0_26 = arith.constant 0 : index
    %234 = vector.load %arg9[%c0_25, %c0_26] : memref<128x128xbf16, #tpu.memory_space<vmem>>, vector<128x128xbf16>
    %cst_27 = arith.constant dense<0.000000e+00> : vector<8x128xf32>
    %235 = tpu.matmul %233, %234, %cst_27 {dimension_numbers = #tpu.dot_dimension_numbers<[1], [0], [0], [1], [0, 0, 1, 1], [], []>} : vector<8x128xbf16>, vector<128x128xbf16>, vector<8x128xf32> -> vector<8x128xf32>
    %c0_28 = arith.constant 0 : index
    %c0_29 = arith.constant 0 : index
    %236 = vector.load %arg10[%c0_28, %c0_29] : memref<1x128xf32, #tpu.memory_space<vmem>>, vector<1x128xf32>
    %237 = vector.broadcast %236 : vector<1x128xf32> to vector<8x128xf32>
    %238 = arith.addf %235, %237 : vector<8x128xf32>
    %cst_30 = arith.constant 0.000000e+00 : f32
    %239 = vector.broadcast %cst_30 : f32 to vector<8x128xf32>
    %240 = arith.cmpf ogt, %238, %239 : vector<8x128xf32>
    %cst_31 = arith.constant 0.00999999977 : f32
    %241 = vector.broadcast %cst_31 : f32 to vector<8x128xf32>
    %242 = arith.mulf %241, %238 : vector<8x128xf32>
    %243 = arith.select %240, %238, %242 : vector<8x128xi1>, vector<8x128xf32>
    %244 = arith.truncf %243 : vector<8x128xf32> to vector<8x128xbf16>
    %c0_32 = arith.constant 0 : index
    %c0_33 = arith.constant 0 : index
    %245 = vector.load %arg11[%c0_32, %c0_33] : memref<8x128xbf16, #tpu.memory_space<vmem>>, vector<8x128xbf16>
    tpu.vector_store %arg11[%c0_32, %c0_33], %244 {strides = array<i32>} : memref<8x128xbf16, #tpu.memory_space<vmem>>, vector<8x128xbf16>,
    return
  }
  func.func @transform_0(%arg0: i32) -> (i32, i32) {
    %c0_i32 = arith.constant 0 : i32
    %c0_i32_0 = arith.constant 0 : i32
    return %arg0, %c0_i32 : i32, i32
  }
  func.func @transform_1(%arg0: i32) -> (i32, i32) {
    %c0_i32 = arith.constant 0 : i32
    %c0_i32_0 = arith.constant 0 : i32
    return %arg0, %c0_i32 : i32, i32
  }
  func.func @transform_2(%arg0: i32) -> (i32, i32) {
    %c0_i32 = arith.constant 0 : i32
    %c0_i32_0 = arith.constant 0 : i32
    %c0_i32_1 = arith.constant 0 : i32
    return %c0_i32, %c0_i32_0 : i32, i32
  }
  func.func @transform_3(%arg0: i32) -> (i32, i32) {
    %c0_i32 = arith.constant 0 : i32
    %c0_i32_0 = arith.constant 0 : i32
    %c0_i32_1 = arith.constant 0 : i32
    return %c0_i32, %c0_i32_0 : i32, i32
  }
  func.func @transform_4(%arg0: i32) -> (i32, i32) {
    %c0_i32 = arith.constant 0 : i32
    %c0_i32_0 = arith.constant 0 : i32
    %c0_i32_1 = arith.constant 0 : i32
    return %c0_i32, %c0_i32_0 : i32, i32
  }
  func.func @transform_5(%arg0: i32) -> (i32, i32) {
    %c0_i32 = arith.constant 0 : i32
    %c0_i32_0 = arith.constant 0 : i32
    %c0_i32_1 = arith.constant 0 : i32
    return %c0_i32, %c0_i32_0 : i32, i32
  }
  func.func @transform_6(%arg0: i32) -> (i32, i32) {
    %c0_i32 = arith.constant 0 : i32
    %c0_i32_0 = arith.constant 0 : i32
    %c0_i32_1 = arith.constant 0 : i32
    return %c0_i32, %c0_i32_0 : i32, i32
  }
  func.func @transform_7(%arg0: i32) -> (i32, i32) {
    %c0_i32 = arith.constant 0 : i32
    %c0_i32_0 = arith.constant 0 : i32
    %c0_i32_1 = arith.constant 0 : i32
    return %c0_i32, %c0_i32_0 : i32, i32
  }
  func.func @transform_8(%arg0: i32) -> (i32, i32) {
    %c0_i32 = arith.constant 0 : i32
    %c0_i32_0 = arith.constant 0 : i32
    %c0_i32_1 = arith.constant 0 : i32
    return %c0_i32, %c0_i32_0 : i32, i32
  }
  func.func @transform_9(%arg0: i32) -> (i32, i32) {
    %c0_i32 = arith.constant 0 : i32
    %c0_i32_0 = arith.constant 0 : i32
    %c0_i32_1 = arith.constant 0 : i32
    return %c0_i32, %c0_i32_0 : i32, i32
  }
  func.func @transform_10(%arg0: i32) -> (i32, i32) {
    %c0_i32 = arith.constant 0 : i32
    %c0_i32_0 = arith.constant 0 : i32
    return %arg0, %c0_i32 : i32, i32
  }
}

</mosaic_0001>

<bundles_post_ra>
// kernel: tpu_custom_call.1
= control target key start
LH: loop header
LB: loop body
LE: loop exit
PB: predicated region body
PF: predicated region fallthrough
CT: control target
= control target key end

     0   :  { %15 = vsyncpa [#allocation3], 0  ;;  %s1393_s0 = inlined_call_operand.hbm [shape: f32[8,24], index: 0, kind: input, shape index: {}]   ;;  %s1394_s1 = inlined_call_operand.hbm [shape: f32[8,8], index: 1, kind: input, shape index: {}]   ;;  %s1395_s2 = inlined_call_operand.hbm [shape: f32[3,128], index: 2, kind: input, shape index: {}]   ;;  %s1396_s3 = inlined_call_operand.vmem [shape: f32[1,128], index: 3, kind: input, shape index: {}]   ;;  %s1397_s4 = inlined_call_operand.hbm [shape: bf16[128,128], index: 4, kind: input, shape index: {}]   ;;  %s1398_s5 = inlined_call_operand.vmem [shape: f32[1,128], index: 5, kind: input, shape index: {}]   ;;  %s1399_s6 = inlined_call_operand.hbm [shape: bf16[256,128], index: 6, kind: input, shape index: {}]   ;;  %s1400_s7 = inlined_call_operand.vmem [shape: f32[1,128], index: 7, kind: input, shape index: {}]   ;;  %s1401_s8 = inlined_call_operand.hbm [shape: bf16[128,128], index: 8, kind: input, shape index: {}]   ;;  %s1402_s9 = inlined_call_operand.vmem [shape: f32[1,128], index: 9, kind: input, shape index: {}]   ;;  %s1403_s10 = inlined_call_operand.hbm [shape: bf16[8,128], index: 10, kind: output, shape index: {}]  }
   0x1   :  { %16 = vsyncpa [#allocation6], 0 }
   0x2   :  { %17 = vsyncpa [#allocation9], 0 }
   0x3   :  { %18 = vsyncpa [#allocation12], 0  ;;  %s36_s15 = sshll.u32 %s1394_s1, 4  ;;  %s37_s15 = int_to_ptr.hbm [resolvable:$true] %s36_s15 }
   0x4   :  { %19 = vsyncpa [#allocation4], 0  ;;  %s1171_s16 = smov [#allocation5]   ;;  %s59_s20 = sshll.u32 %s1397_s4, 4  ;;  %s60_s20 = int_to_ptr.hbm [resolvable:$true] %s59_s20 }
   0x5   :  { %s38_s17 = sshll.u32 %s1171_s16, 4  ;;  %s1172_s21 = smov [#allocation8]   ;;  %s39_s17 = int_to_ptr.vmem [resolvable:$true] %s38_s17 }
   0x6   :  { %41 = dma.hbm_to_vmem [thread:$0]  %s37_s15, 128, %s39_s17, [#allocation6]  }
   0x7   :  { %s61_s22 = sshll.u32 %s1172_s21, 4  ;;  %s1173_s23 = smov 64   ;;  %s62_s22 = int_to_ptr.vmem [resolvable:$true] %s61_s22 }
   0x8   :  { %s1174_s24 = smov 4   ;;  %s25_s1 = sshll.u32 %s1393_s0, 4  ;;  %s26_s1 = int_to_ptr.hbm [resolvable:$true] %s25_s1 }
   0x9   :  { %67 = dma.hbm_to_vmem [thread:$0]  %s60_s20, 1024, %s62_s22, [#allocation9], %s1173_s23, %s1173_s23, %s1174_s24  }
   0xa   :  { %s1175_s27 = smov [#allocation2]   ;;  %s47_s4 = sshll.u32 %s1395_s2, 4  ;;  %s48_s4 = int_to_ptr.hbm [resolvable:$true] %s47_s4 }
   0xb   :  { %s27_s28 = sshll.u32 %s1175_s27, 4  ;;  %s1176_s11 = smov [#allocation7]   ;;  %s28_s28 = int_to_ptr.vmem [resolvable:$true] %s27_s28 }
   0xc   :  { %30 = dma.hbm_to_vmem [thread:$0]  %s26_s1, 128, %s28_s28, [#allocation3]  }
   0xd   :  { %s49_s12 = sshll.u32 %s1176_s11, 4  ;;  %s74_s15 = sshll.u32 %s1399_s6, 4  ;;  %s50_s12 = int_to_ptr.vmem [resolvable:$true] %s49_s12  ;;  %s75_s15 = int_to_ptr.hbm [resolvable:$true] %s74_s15 }
   0xe   :  { %52 = dma.hbm_to_vmem [thread:$0]  %s48_s4, 64, %s50_s12, [#allocation6]  }
   0xf   :  { %s89_s17 = sshll.u32 %s1401_s8, 4  ;;  %s1177_s18 = smov [#allocation10]   ;;  %s90_s17 = int_to_ptr.hbm [resolvable:$true] %s89_s17 }
  0x10   :  { %s76_s19 = sshll.u32 %s1177_s18, 4  ;;  %s1178_s2 = smov [#allocation11]   ;;  %s77_s19 = int_to_ptr.vmem [resolvable:$true] %s76_s19 }
  0x11   :  { %82 = dma.hbm_to_vmem [thread:$0]  %s75_s15, 2048, %s77_s19, [#allocation9], %s1173_s23, %s1173_s23, %s1174_s24  }
  0x12   :  { %s91_s20 = sshll.u32 %s1178_s2, 4  ;;  %s92_s20 = int_to_ptr.vmem [resolvable:$true] %s91_s20 }
  0x13   :  { %97 = dma.hbm_to_vmem [thread:$0]  %s90_s17, 1024, %s92_s20, [#allocation12], %s1173_s23, %s1173_s23, %s1174_s24  }
  0x14   :  { %1161 = dma.done.wait [#allocation3], 128  }
  0x15   :  { %1162 = vsyncadd [#allocation3], 4294967168 }
  0x16   :  { %1163 = dma.done.wait [#allocation6], 192  }
  0x17   :  { %1164 = vsyncadd [#allocation6], 4294967104 }
  0x18   :  { %1165 = dma.done.wait [#allocation9], 3072  }
  0x19   :  { %1166 = vsyncadd [#allocation9], 4294964224 }
  0x1a   :  { %1167 = dma.done.wait [#allocation12], 1024  }
  0x1b   :  { %1168 = vsyncadd [#allocation12], 4294966272  ;;  %v1179_v0 = vmov 3   ;;  %v1180_v1 = vmov 0   ;;  %v1181_v2 = vmov 2   ;;  %v1280_v3 = vld [vmem:[#allocation2] sm:$0xff] }
  0x1c   :  { %957 = vset.pattern.permute.xlu1 %v1179_v0  ;;  %955 = vset.pattern.permute.xlu0 %v1180_v1  ;;  %v1182_v4 = vmov 4   ;;  %v1183_v5 = vmov 1   ;;  %v1184_v6 = vmov 5   ;;  %v1185_v7 = vmov 12   ;;  %v889_v16 = vld [vmem:[#allocation8 + $0x38] sm:$0xff]  ;;  %v888_v20 = vld [vmem:[#allocation8 + $0x30] sm:$0xff] }
  0x1d   :  { %959 = vset.pattern.permute.xlu2 %v1181_v2  ;;  %154 = vperm.xlu1 %957, %v1280_v3   ;;  %v1186_v8 = vmov 15   ;;  %v1187_v9 = vmov 13   ;;  %v1188_v10 = vmov 16   ;;  %v1189_v11 = vmov 7   ;;  %v887_v23 = vld [vmem:[#allocation8 + $0x28] sm:$0xff]  ;;  %v886_v28 = vld [vmem:[#allocation8 + $0x20] sm:$0xff] }
  0x1e   :  { %130 = vperm.xlu0 %955, %v1280_v3   ;;  %143 = vperm.xlu2 %959, %v1280_v3   ;;  %v1190_v12 = vmov 14   ;;  %v1191_v13 = vmov 17   ;;  %v1192_v14 = vmov 18   ;;  %v1193_v15 = vmov 6   ;;  %v885_v29 = vld [vmem:[#allocation8 + $0x18] sm:$0xff]  ;;  %v884_v30 = vld [vmem:[#allocation8 + $0x10] sm:$0xff] }
  0x1f   :  { %v1194_v17 = vmov 9   ;;  %v1195_v18 = vmov 23   ;;  %v1196_v19 = vmov 10   ;;  %375 = vmatpush.bf16.msra.mxu0 %v889_v16  ;;  %914 = vmatpush.bf16.msra.mxu1 %v889_v16  ;;  %v1197_v21 = vmov 8   ;;  %v883_v31 = vld [vmem:[#allocation8 + $0x8] sm:$0xff]  ;;  %v882_v33 = vld [vmem:[#allocation8] sm:$0xff] }
  0x20   :  { %v1198_v22 = vmov 11   ;;  %v1199_v24 = vmov 19   ;;  %v1200_v25 = vmov 21   ;;  %v1201_v26 = vmov 22   ;;  %v126_v37 = vld [vmem:[#allocation7] sm:$0x7] }
  0x21   :  { %v1202_v27 = vmov 20   ;;  %v1312_v39 = vperm.slane %v126_v37, 0  ;;  %v1314_v40 = vperm.slane %v126_v37, 1  ;;  %v1316_v41 = vld [vmem:[#allocation5] sm:$0xff]  ;;  %v1320_v42 = vperm.slane %v126_v37, 2  ;;  %s741_s27 = sshll.u32 %s1403_s10, 4  ;;  %s742_s27 = int_to_ptr.hbm [resolvable:$true] %s741_s27 }
  0x22   :  { %v1332_v51 = vld [vmem:[%s1396_s3] ss:$0 sm:$0xff]  ;;  %vm476_vm4 = vcmask 64512  }
  0x23   :  { %376 = vmatpush.bf16.msra.mxu0 %v888_v20  ;;  %915 = vmatpush.bf16.msra.mxu1 %v888_v20 }
  0x25   :  { %958 = vset.pattern.permute.xlu1 %v1182_v4 }
  0x26   :  { %956 = vset.pattern.permute.xlu0 %v1183_v5  ;;  %159 = vperm.xlu1 %958, %v1280_v3  }
  0x27   :  { %136 = vperm.xlu0 %956, %v1280_v3   ;;  %960 = vset.pattern.permute.xlu2 %v1184_v6 }
  0x28   :  { %165 = vperm.xlu2 %960, %v1280_v3   ;;  %377 = vmatpush.bf16.msra.mxu0 %v887_v23 }
  0x29   :  { %916 = vmatpush.bf16.msra.mxu1 %v887_v23 }
  0x2c   :  { %378 = vmatpush.bf16.msra.mxu0 %v886_v28 }
  0x2d   :  { %917 = vmatpush.bf16.msra.mxu1 %v886_v28 }
  0x2e   :  { %961 = vset.pattern.permute.xlu1 %v1185_v7 }
  0x2f   :  { %963 = vset.pattern.permute.xlu0 %v1186_v8  ;;  %208 = vperm.xlu1 %961, %v1280_v3  }
  0x30   :  { %226 = vperm.xlu0 %963, %v1280_v3   ;;  %962 = vset.pattern.permute.xlu2 %v1187_v9 }
  0x31   :  { %213 = vperm.xlu2 %962, %v1280_v3   ;;  %379 = vmatpush.bf16.msra.mxu0 %v885_v29 }
  0x32   :  { %918 = vmatpush.bf16.msra.mxu1 %v885_v29 }
  0x35   :  { %380 = vmatpush.bf16.msra.mxu0 %v884_v30 }
  0x36   :  { %919 = vmatpush.bf16.msra.mxu1 %v884_v30 }
  0x37   :  { %964 = vset.pattern.permute.xlu1 %v1188_v10 }
  0x38   :  { %968 = vset.pattern.permute.xlu0 %v1189_v11  ;;  %231 = vperm.xlu1 %964, %v1280_v3  }
  0x39   :  { %177 = vperm.xlu0 %968, %v1280_v3   ;;  %965 = vset.pattern.permute.xlu2 %v1190_v12 }
  0x3a   :  { %219 = vperm.xlu2 %965, %v1280_v3   ;;  %381 = vmatpush.bf16.msra.mxu0 %v883_v31 }
  0x3b   :  { %920 = vmatpush.bf16.msra.mxu1 %v883_v31 }
  0x3e   :  { %382 = vmatpush.bf16.msra.mxu0 %v882_v33 }
  0x3f   :  { %921 = vmatpush.bf16.msra.mxu1 %v882_v33 }
  0x40   :  { %966 = vset.pattern.permute.xlu1 %v1191_v13 }
  0x41   :  { %973 = vset.pattern.permute.xlu0 %v1192_v14  ;;  %237 = vperm.xlu1 %966, %v1280_v3  }
  0x42   :  { %244 = vperm.xlu0 %973, %v1280_v3   ;;  %967 = vset.pattern.permute.xlu2 %v1193_v15 }
  0x43   :  { %172 = vperm.xlu2 %967, %v1280_v3  }
  0x49   :  { %969 = vset.pattern.permute.xlu1 %v1194_v17 }
  0x4a   :  { %978 = vset.pattern.permute.xlu0 %v1195_v18  ;;  %190 = vperm.xlu1 %969, %v1280_v3  }
  0x4b   :  { %273 = vperm.xlu0 %978, %v1280_v3   ;;  %970 = vset.pattern.permute.xlu2 %v1196_v19 }
  0x4c   :  { %195 = vperm.xlu2 %970, %v1280_v3  }
  0x52   :  { %971 = vset.pattern.permute.xlu1 %v1197_v21 }
  0x53   :  { %983 = vset.pattern.permute.xlu0 %v1182_v4  ;;  %183 = vperm.xlu1 %971, %v1280_v3  }
  0x54   :  { %972 = vset.pattern.permute.xlu2 %v1198_v22  ;;  %453 = vperm.xlu0 %983, %v1316_v41  }
  0x55   :  { %201 = vperm.xlu2 %972, %v1280_v3  }
  0x5b   :  { %974 = vset.pattern.permute.xlu1 %v1199_v24 }
  0x5c   :  { %249 = vperm.xlu1 %974, %v1280_v3   ;;  %986 = vset.pattern.permute.xlu0 %v1189_v11 }
  0x5d   :  { %975 = vset.pattern.permute.xlu2 %v1200_v25  ;;  %471 = vperm.xlu0 %986, %v1316_v41  }
  0x5e   :  { %262 = vperm.xlu2 %975, %v1280_v3  }
  0x64   :  { %976 = vset.pattern.permute.xlu1 %v1201_v26 }
  0x65   :  { %267 = vperm.xlu1 %976, %v1280_v3  }
  0x66   :  { %977 = vset.pattern.permute.xlu2 %v1202_v27 }
  0x67   :  { %255 = vperm.xlu2 %977, %v1280_v3  }
  0x6d   :  { %979 = vset.pattern.permute.xlu1 %v1180_v1 }
  0x6e   :  { %430 = vperm.xlu1 %979, %v1316_v41  }
  0x6f   :  { %980 = vset.pattern.permute.xlu2 %v1183_v5 }
  0x70   :  { %435 = vperm.xlu2 %980, %v1316_v41  }
  0x76   :  { %981 = vset.pattern.permute.xlu1 %v1181_v2 }
  0x77   :  { %441 = vperm.xlu1 %981, %v1316_v41  }
  0x78   :  { %v144_v32 = vpop.permute.xlu2 %143  ;;  %982 = vset.pattern.permute.xlu2 %v1179_v0 }
  0x79   :  { %v147_v50 = vmul.f32 %v1320_v42, %v144_v32  ;;  %447 = vperm.xlu2 %982, %v1316_v41  }
  0x7f   :  { %984 = vset.pattern.permute.xlu1 %v1184_v6 }
  0x80   :  { %459 = vperm.xlu1 %984, %v1316_v41  }
  0x82   :  { %v166_v34 = vpop.permute.xlu2 %165 }
  0x83   :  { %v168_v47 = vmul.f32 %v166_v34, %v1320_v42 }
  0x88   :  { %985 = vset.pattern.permute.xlu1 %v1193_v15 }
  0x89   :  { %465 = vperm.xlu1 %985, %v1316_v41  }
  0x8b   :  { %v214_v38 = vpop.permute.xlu2 %213 }
  0x8c   :  { %v216_v2 = vmul.f32 %v214_v38, %v1314_v40  ;;  %v477_v38 = vsel %vm476_vm4, %v1316_v41, 0.0 }
  0x8f   :  { %v155_v35 = vpop.permute.xlu1 %154 }
  0x90   :  { %v131_v36 = vpop.permute.xlu0 %130  ;;  %v157_v46 = vmul.f32 %v155_v35, %v1312_v39 }
  0x91   :  { %v134_v43 = vmul.f32 %v1312_v39, %v131_v36 }
  0x94   :  { %v220_v56 = vpop.permute.xlu2 %219 }
  0x95   :  { %v222_v7 = vmul.f32 %v220_v56, %v1320_v42 }
  0x98   :  { %v160_v44 = vpop.permute.xlu1 %159 }
  0x99   :  { %v137_v45 = vpop.permute.xlu0 %136  ;;  %v162_v48 = vmul.f32 %v160_v44, %v1314_v40 }
  0x9a   :  { %v140_v49 = vmul.f32 %v1314_v40, %v137_v45 }
  0x9b   :  { %v163_v52 = vadd.f32 %v162_v48, %v157_v46 }
  0x9c   :  { %v141_v53 = vadd.f32 %v140_v49, %v134_v43 }
  0x9d   :  { %v169_v54 = vadd.f32 %v168_v47, %v163_v52  ;;  %v173_v1 = vpop.permute.xlu2 %172 }
  0x9e   :  { %v148_v55 = vadd.f32 %v147_v50, %v141_v53  ;;  %v175_v30 = vmul.f32 %v173_v1, %v1312_v39 }
  0x9f   :  { %v170_v57 = vadd.f32 %v1332_v51, %v169_v54 }
  0xa0   :  { %v152_v58 = vadd.f32 %v1332_v51, %v148_v55 }
  0xa1   :  { %v209_v59 = vpop.permute.xlu1 %208  ;;  %vm280_vm1 = vcmp.gt.f32.partialorder %v170_v57, 0.0  ;;  %v288_v61 = vmul.f32 0.01, %v170_v57 }
  0xa2   :  { %vm279_vm0 = vcmp.gt.f32.partialorder %v152_v58, 0.0  ;;  %v287_v60 = vmul.f32 0.01, %v152_v58  ;;  %v211_v3 = vmul.f32 %v209_v59, %v1312_v39  ;;  %v227_v8 = vpop.permute.xlu0 %226  ;;  %478 = vadd.xlane.f32.xlu2 %v477_v38 }
  0xa3   :  { %v296_v63 = vsel %vm280_vm1, %v170_v57, %v288_v61  ;;  %v229_v11 = vmul.f32 %v227_v8, %v1312_v39 }
  0xa4   :  { %v295_v62 = vsel %vm279_vm0, %v152_v58, %v287_v60  ;;  %v217_v5 = vadd.f32 %v216_v2, %v211_v3 }
  0xa5   :  { %v303_v0 = vpack.c.bf16 %v296_v63, %v295_v62 }
  0xa6   :  { %v223_v9 = vadd.f32 %v222_v7, %v217_v5  ;;  %v196_v12 = vpop.permute.xlu2 %195 }
  0xa7   :  { %383 = vmatmul.bf16.vlgmr.msra.gmra.mxu0 %v303_v0  ;;  %v198_v22 = vmul.f32 %v196_v12, %v1314_v40  ;;  %v895_v12 = vld [vmem:[#allocation10 + $0x28] sm:$0xff] }
  0xa8   :  { %v224_v13 = vadd.f32 %v1332_v51, %v223_v9  ;;  %v905_v9 = vld [vmem:[#allocation10 + $0x78] sm:$0xff] }
  0xa9   :  { %631 = vmatpush.bf16.msra.mxu2 %v905_v9 }
  0xaa   :  { %v232_v4 = vpop.permute.xlu1 %231  ;;  %v291_v19 = vmul.f32 0.01, %v224_v13  ;;  %vm283_vm2 = vcmp.gt.f32.partialorder %v224_v13, 0.0 }
  0xab   :  { %v234_v10 = vmul.f32 %v232_v4, %v1314_v40  ;;  %v178_v28 = vpop.permute.xlu0 %177 }
  0xac   :  { %v299_v15 = vsel %vm283_vm2, %v224_v13, %v291_v19  ;;  %v180_v31 = vmul.f32 %v178_v28, %v1314_v40  ;;  %v901_v13 = vld [vmem:[#allocation10 + $0x58] sm:$0xff]  ;;  %v899_v19 = vld [vmem:[#allocation10 + $0x48] sm:$0xff] }
  0xad   :  { %v235_v14 = vadd.f32 %v234_v10, %v229_v11  ;;  %v897_v10 = vld [vmem:[#allocation10 + $0x38] sm:$0xff]  ;;  %v903_v11 = vld [vmem:[#allocation10 + $0x68] sm:$0xff] }
  0xae   :  { %v181_v35 = vadd.f32 %v180_v31, %v175_v30  ;;  %618 = vmatpush.bf16.msrb.mxu1 %v897_v10 }
  0xaf   :  { %v202_v20 = vpop.permute.xlu2 %201 }
  0xb0   :  { %v204_v27 = vmul.f32 %v202_v20, %v1320_v42 }
  0xb3   :  { %v238_v6 = vpop.permute.xlu1 %237 }
  0xb4   :  { %v240_v16 = vmul.f32 %v238_v6, %v1320_v42  ;;  %v245_v45 = vpop.permute.xlu0 %244  ;;  %v894_v6 = vld [vmem:[#allocation10 + $0x20] sm:$0xff] }
  0xb5   :  { %v247_v49 = vmul.f32 %v245_v45, %v1312_v39 }
  0xb6   :  { %v241_v17 = vadd.f32 %v240_v16, %v235_v14  ;;  %v893_v16 = vld [vmem:[#allocation10 + $0x18] sm:$0xff] }
  0xb8   :  { %v242_v18 = vadd.f32 %v1332_v51, %v241_v17  ;;  %v263_v33 = vpop.permute.xlu2 %262  ;;  %v900_v17 = vld [vmem:[#allocation10 + $0x50] sm:$0xff] }
  0xb9   :  { %v265_v61 = vmul.f32 %v263_v33, %v1312_v39 }
  0xba   :  { %vm284_vm3 = vcmp.gt.f32.partialorder %v242_v18, 0.0  ;;  %v292_v21 = vmul.f32 0.01, %v242_v18 }
  0xbc   :  { %v191_v23 = vpop.permute.xlu1 %190  ;;  %v300_v24 = vsel %vm284_vm3, %v242_v18, %v292_v21  ;;  %v892_v18 = vld [vmem:[#allocation10 + $0x10] sm:$0xff] }
  0xbd   :  { %v193_v25 = vmul.f32 %v191_v23, %v1312_v39  ;;  %v305_v26 = vpack.c.bf16 %v300_v24, %v299_v15  ;;  %v274_v59 = vpop.permute.xlu0 %273  ;;  %v904_v39 = vld [vmem:[#allocation10 + $0x70] sm:$0xff]  ;;  %v1374_v24 = vld [vmem:[%s1398_s5] ss:$0 sm:$0xff] }
  0xbe   :  { %v276_v63 = vmul.f32 %v274_v59, %v1320_v42  ;;  %632 = vmatpush.bf16.msra.mxu2 %v904_v39 }
  0xbf   :  { %v199_v29 = vadd.f32 %v198_v22, %v193_v25  ;;  %393 = vmatmul.bf16.vlgmr.msra.gmra.mxu1 %v305_v26  ;;  %v891_v22 = vld [vmem:[#allocation10 + $0x8] sm:$0xff]  ;;  %v898_v25 = vld [vmem:[#allocation10 + $0x40] sm:$0xff] }
  0xc0   :  { %v890_v26 = vld [vmem:[#allocation10] sm:$0xff] }
  0xc1   :  { %v205_v32 = vadd.f32 %v204_v27, %v199_v29  ;;  %v256_v47 = vpop.permute.xlu2 %255 }
  0xc2   :  { %v258_v55 = vmul.f32 %v256_v47, %v1320_v42  ;;  %633 = vmatpush.bf16.msra.mxu2 %v903_v11 }
  0xc3   :  { %v206_v36 = vadd.f32 %v1332_v51, %v205_v32 }
  0xc5   :  { %v184_v34 = vpop.permute.xlu1 %183  ;;  %v290_v46 = vmul.f32 0.01, %v206_v36  ;;  %vm282_vm5 = vcmp.gt.f32.partialorder %v206_v36, 0.0 }
  0xc6   :  { %v186_v37 = vmul.f32 %v184_v34, %v1320_v42  ;;  %v913_v34 = vld [vmem:[#allocation11 + $0x38] sm:$0xff] }
  0xc7   :  { %v298_v53 = vsel %vm282_vm5, %v206_v36, %v290_v46  ;;  %716 = vmatpush.bf16.msra.mxu3 %v913_v34 }
  0xc8   :  { %v187_v43 = vadd.f32 %v186_v37, %v181_v35 }
  0xca   :  { %v188_v44 = vadd.f32 %v1332_v51, %v187_v43  ;;  %v436_v23 = vpop.permute.xlu2 %435  ;;  %v912_v43 = vld [vmem:[#allocation11 + $0x30] sm:$0xff] }
  0xcb   :  { %717 = vmatpush.bf16.msra.mxu3 %v912_v43 }
  0xcc   :  { %vm281_vm6 = vcmp.gt.f32.partialorder %v188_v44, 0.0  ;;  %v289_v48 = vmul.f32 0.01, %v188_v44 }
  0xce   :  { %v250_v50 = vpop.permute.xlu1 %249  ;;  %v297_v52 = vsel %vm281_vm6, %v188_v44, %v289_v48 }
  0xcf   :  { %v252_v54 = vmul.f32 %v250_v50, %v1314_v40  ;;  %v304_v41 = vpack.c.bf16 %v298_v53, %v297_v52  ;;  %v911_v50 = vld [vmem:[#allocation11 + $0x28] sm:$0xff] }
  0xd0   :  { %718 = vmatpush.bf16.msra.mxu3 %v911_v50 }
  0xd1   :  { %v253_v56 = vadd.f32 %v252_v54, %v247_v49  ;;  %388 = vmatmul.bf16.gmra.mxu0 %v304_v41 }
  0xd3   :  { %v259_v57 = vadd.f32 %v258_v55, %v253_v56  ;;  %v448_v37 = vpop.permute.xlu2 %447 }
  0xd5   :  { %v260_v58 = vadd.f32 %v1332_v51, %v259_v57 }
  0xd7   :  { %v268_v60 = vpop.permute.xlu1 %267  ;;  %v293_v3 = vmul.f32 0.01, %v260_v58  ;;  %vm285_vm7 = vcmp.gt.f32.partialorder %v260_v58, 0.0 }
  0xd8   :  { %v270_v62 = vmul.f32 %v268_v60, %v1314_v40  ;;  %v896_v40 = vld [vmem:[#allocation10 + $0x30] sm:$0xff] }
  0xd9   :  { %v301_v5 = vsel %vm285_vm7, %v260_v58, %v293_v3  ;;  %619 = vmatpush.bf16.msrb.mxu1 %v896_v40 }
  0xda   :  { %v271_v0 = vadd.f32 %v270_v62, %v265_v61  ;;  %v910_v61 = vld [vmem:[#allocation11 + $0x20] sm:$0xff] }
  0xdb   :  { %719 = vmatpush.bf16.msra.mxu3 %v910_v61 }
  0xdc   :  { %v277_v1 = vadd.f32 %v276_v63, %v271_v0 }
  0xdd   :  { %620 = vmatpush.bf16.msrb.mxu1 %v895_v12 }
  0xde   :  { %v278_v2 = vadd.f32 %v1332_v51, %v277_v1  ;;  %v902_v51 = vld [vmem:[#allocation10 + $0x60] sm:$0xff]  ;;  %v454_v1 = vpop.permute.xlu0 %453 }
  0xdf   :  { %634 = vmatpush.bf16.msra.mxu2 %v902_v51 }
  0xe0   :  { %vm286_vm8 = vcmp.gt.f32.partialorder %v278_v2, 0.0  ;;  %v294_v4 = vmul.f32 0.01, %v278_v2  ;;  %v431_v21 = vpop.permute.xlu1 %430 }
  0xe1   :  { %621 = vmatpush.bf16.msrb.mxu1 %v894_v6 }
  0xe2   :  { %v302_v7 = vsel %vm286_vm8, %v278_v2, %v294_v4 }
  0xe3   :  { %v306_v8 = vpack.c.bf16 %v302_v7, %v301_v5  ;;  %635 = vmatpush.bf16.msra.mxu2 %v901_v13  ;;  %v909_v5 = vld [vmem:[#allocation11 + $0x18] sm:$0xff] }
  0xe4   :  { %720 = vmatpush.bf16.msra.mxu3 %v909_v5 }
  0xe5   :  { %398 = vmatmul.bf16.gmra.mxu1 %v306_v8 }
  0xe6   :  { %622 = vmatpush.bf16.msrb.mxu1 %v893_v16  ;;  %v472_v13 = vpop.permute.xlu0 %471 }
  0xe7   :  { %636 = vmatpush.bf16.msra.mxu2 %v900_v17 }
  0xe9   :  { %v442_v32 = vpop.permute.xlu1 %441 }
  0xea   :  { %623 = vmatpush.bf16.msrb.mxu1 %v892_v18 }
  0xeb   :  { %637 = vmatpush.bf16.msra.mxu2 %v899_v19 }
  0xee   :  { %624 = vmatpush.bf16.msrb.mxu1 %v891_v22 }
  0xef   :  { %638 = vmatpush.bf16.msra.mxu2 %v898_v25  ;;  %v907_v25 = vld [vmem:[#allocation11 + $0x8] sm:$0xff] }
  0xf2   :  { %625 = vmatpush.bf16.msrb.mxu1 %v890_v26  ;;  %v460_v56 = vpop.permute.xlu1 %459  ;;  %v989_v26 = vld [vmem:[%s1400_s7] ss:$0 sm:$0xff]  ;;  %s1203_s7 = smov [#allocation13]  }
  0xf3   :  { %s739_s25 = sshll.u32 %s1203_s7, 4  ;;  %s740_s25 = int_to_ptr.vmem [resolvable:$true] %s739_s25 }
  0xfb   :  { %v466_v10 = vpop.permute.xlu1 %465 }
 0x115   :  { %v479_v60 = vpop.xlane.xlu2 %478 }
 0x116   :  { %vm480_vm14 = vcmp.gt.f32.partialorder %v479_v60, 0.0 }
 0x117   :  { %v481_v8 = vsel %vm480_vm14, %v479_v60, 1.0 }
 0x118   :  { %991 = vrcp.f32 %v481_v8 }
 0x11e   :  { %v992_v19 = vpop.eup %991 }
 0x124   :  { %v384_v42 = vpop.f32.mrf.mxu0 }
 0x125   :  { %v385_v28 = vadd.f32 %v1374_v24, %v384_v42 }
 0x127   :  { %v412_v35 = vmul.f32 0.01, %v385_v28  ;;  %vm404_vm10 = vcmp.gt.f32.partialorder %v385_v28, 0.0 }
 0x129   :  { %v420_v46 = vsel %vm404_vm10, %v385_v28, %v412_v35 }
 0x12a   :  { %v433_v53 = vmul.f32 %v431_v21, %v420_v46 }
 0x12c   :  { %v386_v14 = vpop.f32.mrf.mxu0 }
 0x12d   :  { %v387_v27 = vadd.f32 %v1374_v24, %v386_v14 }
 0x12f   :  { %v413_v31 = vmul.f32 0.01, %v387_v27  ;;  %vm405_vm9 = vcmp.gt.f32.partialorder %v387_v27, 0.0 }
 0x131   :  { %v421_v44 = vsel %vm405_vm9, %v387_v27, %v413_v31 }
 0x132   :  { %v438_v49 = vmul.f32 %v436_v23, %v421_v44 }
 0x134   :  { %v439_v57 = vadd.f32 %v438_v49, %v433_v53 }
 0x13c   :  { %v394_v15 = vpop.f32.mrf.mxu1 }
 0x13d   :  { %v395_v47 = vadd.f32 %v1374_v24, %v394_v15  ;;  %v908_v15 = vld [vmem:[#allocation11 + $0x10] sm:$0xff] }
 0x13e   :  { %721 = vmatpush.bf16.msra.mxu3 %v908_v15 }
 0x13f   :  { %v416_v55 = vmul.f32 0.01, %v395_v47  ;;  %vm408_vm13 = vcmp.gt.f32.partialorder %v395_v47, 0.0 }
 0x141   :  { %v424_v0 = vsel %vm408_vm13, %v395_v47, %v416_v55 }
 0x142   :  { %v456_v7 = vmul.f32 %v454_v1, %v424_v0  ;;  %722 = vmatpush.bf16.msra.mxu3 %v907_v25 }
 0x144   :  { %v396_v38 = vpop.f32.mrf.mxu1 }
 0x145   :  { %v397_v41 = vadd.f32 %v1374_v24, %v396_v38 }
 0x147   :  { %v417_v2 = vmul.f32 0.01, %v397_v41  ;;  %vm409_vm15 = vcmp.gt.f32.partialorder %v397_v41, 0.0 }
 0x149   :  { %v425_v9 = vsel %vm409_vm15, %v397_v41, %v417_v2 }
 0x14a   :  { %v462_v12 = vmul.f32 %v460_v56, %v425_v9 }
 0x14e   :  { %v389_v20 = vpop.f32.mrf.mxu0 }
 0x14f   :  { %v390_v29 = vadd.f32 %v1374_v24, %v389_v20 }
 0x151   :  { %v414_v36 = vmul.f32 0.01, %v390_v29  ;;  %vm406_vm11 = vcmp.gt.f32.partialorder %v390_v29, 0.0 }
 0x153   :  { %v422_v48 = vsel %vm406_vm11, %v390_v29, %v414_v36  ;;  %v990_v36 = vld [vmem:[%s1402_s9] ss:$0 sm:$0xff] }
 0x154   :  { %v444_v54 = vmul.f32 %v442_v32, %v422_v48 }
 0x156   :  { %v391_v30 = vpop.f32.mrf.mxu0  ;;  %v445_v63 = vadd.f32 %v444_v54, %v439_v57 }
 0x157   :  { %v392_v33 = vadd.f32 %v1374_v24, %v391_v30 }
 0x159   :  { %v415_v45 = vmul.f32 0.01, %v392_v33  ;;  %vm407_vm12 = vcmp.gt.f32.partialorder %v392_v33, 0.0 }
 0x15b   :  { %v423_v52 = vsel %vm407_vm12, %v392_v33, %v415_v45 }
 0x15c   :  { %v450_v58 = vmul.f32 %v448_v37, %v423_v52 }
 0x15e   :  { %v451_v4 = vadd.f32 %v450_v58, %v445_v63 }
 0x160   :  { %v457_v40 = vadd.f32 %v456_v7, %v451_v4 }
 0x162   :  { %v399_v59 = vpop.f32.mrf.mxu1  ;;  %v463_v14 = vadd.f32 %v462_v12, %v457_v40 }
 0x163   :  { %v400_v62 = vadd.f32 %v1374_v24, %v399_v59 }
 0x165   :  { %v418_v3 = vmul.f32 0.01, %v400_v62  ;;  %vm410_vm0 = vcmp.gt.f32.partialorder %v400_v62, 0.0 }
 0x167   :  { %v426_v39 = vsel %vm410_vm0, %v400_v62, %v418_v3 }
 0x168   :  { %v468_v51 = vmul.f32 %v466_v10, %v426_v39 }
 0x16a   :  { %v401_v42 = vpop.f32.mrf.mxu1  ;;  %v469_v17 = vadd.f32 %v468_v51, %v463_v14 }
 0x16b   :  { %v402_v11 = vadd.f32 %v1374_v24, %v401_v42  ;;  %v906_v24 = vld [vmem:[#allocation11] sm:$0xff] }
 0x16c   :  { %723 = vmatpush.bf16.msra.mxu3 %v906_v24 }
 0x16d   :  { %v419_v6 = vmul.f32 0.01, %v402_v11  ;;  %vm411_vm1 = vcmp.gt.f32.partialorder %v402_v11, 0.0 }
 0x16f   :  { %v427_v16 = vsel %vm411_vm1, %v402_v11, %v419_v6 }
 0x170   :  { %v474_v18 = vmul.f32 %v472_v13, %v427_v16 }
 0x172   :  { %v475_v20 = vadd.f32 %v474_v18, %v469_v17 }
 0x174   :  { %v485_v21 = vpack.c.bf16 %v475_v20, %v475_v20  ;;  %v483_v22 = vmul.f32 %v992_v19, %v475_v20 }
 0x176   :  { %639 = vmatmul.bf16.vlgmr.msra.gmra.mxu2 %v485_v21  ;;  %v484_v23 = vpack.c.bf16 %v483_v22, %v483_v22 }
 0x178   :  { %626 = vmatmul.bf16.vlgmr.msrb.gmra.mxu1 %v484_v23 }
 0x1f5   :  { %v627_v27 = vpop.f32.mrf.mxu1 }
 0x1f6   :  { %v628_v28 = vadd.f32 %v989_v26, %v627_v27 }
 0x1f9   :  { %v640_v29 = vpop.f32.mrf.mxu2 }
 0x1fa   :  { %v641_v30 = vadd.f32 %v640_v29, %v628_v28 }
 0x1fc   :  { %v645_v31 = vmul.f32 0.01, %v641_v30  ;;  %vm644_vm2 = vcmp.gt.f32.partialorder %v641_v30, 0.0 }
 0x1fd   :  { %v629_v32 = vpop.f32.mrf.mxu1 }
 0x1fe   :  { %v646_v33 = vsel %vm644_vm2, %v641_v30, %v645_v31 }
 0x1ff   :  { %v647_v34 = vpack.c.bf16 %v646_v33, %v646_v33 }
 0x201   :  { %v642_v35 = vpop.f32.mrf.mxu2  ;;  %724 = vmatmul.bf16.vlgmr.msra.gmra.mxu3 %v647_v34 }
 0x284   :  { %v725_v37 = vpop.f32.mrf.mxu3 }
 0x285   :  { %v726_v38 = vadd.f32 %v990_v36, %v725_v37 }
 0x287   :  { %vm729_vm3 = vcmp.gt.f32.partialorder %v726_v38, 0.0  ;;  %v730_v43 = vmul.f32 0.01, %v726_v38 }
 0x289   :  { %v731_v44 = vsel %vm729_vm3, %v726_v38, %v730_v43 }
 0x28a   :  { %v732_v45 = vpack.c.bf16 %v731_v44, %v731_v44 }
 0x28c   :  { %733 = vst [vmem:[#allocation13] sm:$0xf] %v732_v45  ;;  %v727_v46 = vpop.f32.mrf.mxu3 }
 0x28d   :  { %744 = dma.vmem_to_hbm [thread:$0]  %s740_s25, 64, %s742_s27, [#allocation4]  }
 0x28e   :  { %1169 = dma.done.wait [#allocation4], 64  }
 0x28f   :  { %1170 = vsyncadd [#allocation4], 4294967232 }
 0x290   :  { %749 = vsyncpa [#allocation3], 1 }
 0x291   :  { %750 = vsyncpa [#allocation6], 1 }
 0x292   :  { %751 = vsyncpa [#allocation9], 1 }
 0x293   :  { %752 = vsyncpa [#allocation12], 1 }
 0x294   :  { %753 = vsyncpa [#allocation4], 1 }

</bundles_post_ra>
